<compile_context>
chip_gen: v5e
topology: v5e:2x2
jax: 0.10.0
libtpu: 0.0.40
codegen_flags: <defaults>
</compile_context>

<pallas_src>
import math

import jax
import jax.numpy as jnp
from jax import lax
from jax.experimental import pallas as pl
from jax.experimental.pallas import tpu as pltpu


def _clip_loss_kernel(scale_ref, drug_ref, text_ref, out_ref):
    """Single-matmul, single-exp-sweep CLIP loss + accuracy kernel (VMEM resident)."""
    scale = scale_ref[0]
    d = drug_ref[...]                     # (N, D), caller dtype (f32 or bf16)
    t = text_ref[...]                     # (N, D), caller dtype
    n = d.shape[0]
    inv_n = 1.0 / n

    # Single logits matrix on the MXU (f32 accumulator); scale applied to the
    # f32 result, exactly as the reference does.
    contract = (((1,), (1,)), ((), ()))
    logits = scale * lax.dot_general(
        d, t, contract,
        preferred_element_type=jnp.float32,
        precision=lax.Precision.HIGHEST)                             # (N, N) f32

    # Diagonal of the logits computed directly on the VPU: N*D multiplies +
    # lane reduce.  No (N, N) iota / eye mask / masked selects.
    diag = scale * jnp.sum(
        d.astype(jnp.float32) * t.astype(jnp.float32),
        axis=1, keepdims=True)                                        # (N, 1)

    # One shared exp sweep for BOTH logsumexps.  The EUP has a single VLIW
    # slot on every TPU generation, so this halves the binding unit vs two
    # sweeps.  Global-max shift is safe for CLIP-scale logits (bounded by
    # ~|scale| with unit-norm features).
    # TODO(synk): switch to per-row/col max shifts if reused with unbounded
    # logits (a row whose max is >~85 below the global max would underflow).
    m = jnp.max(logits)                                               # scalar
    e = jnp.exp(logits - m)                                           # (N, N)
    row_lse = m + jnp.log(jnp.sum(e, axis=1, keepdims=True))          # (N, 1)
    col_lse = m + jnp.log(jnp.sum(e, axis=0, keepdims=True))          # (1, N)

    # Cross entropies:
    #   CE(logits_per_drug) = mean_i(row_lse[i] - logits[i,i])
    #   CE(logits_per_text) = mean_i(col_lse[i] - logits[i,i])
    sum_diag = jnp.sum(diag)
    ce_d = (jnp.sum(row_lse) - sum_diag) * inv_n
    ce_t = (jnp.sum(col_lse) - sum_diag) * inv_n

    # Accuracies in log space; the shifted matrices are never stored:
    #   softmax(logits.T, dim=0)[j, i] = exp(logits[i, j] - row_lse[i])
    #   row i of that softmax has its max on the diagonal iff
    #     (diag[i] - row_lse[i]) >= max_j (logits[j, i] - row_lse[j])
    # and symmetrically with col_lse for logits_per_drug.
    col_max_a = jnp.max(logits - row_lse, axis=0, keepdims=True)      # (1, N)
    row_max_b = jnp.max(logits - col_lse, axis=1, keepdims=True)      # (N, 1)

    # Small relative tolerance: absorbs MXU-vs-VPU rounding of the diagonal
    # (the diagonal entry inside col_max_a/row_max_b comes from the MXU).
    tol = 1e-5 * (1.0 + jnp.abs(m))
    hit_t = jnp.reshape(diag - row_lse, (1, n)) >= (col_max_a - tol)  # (1, N)
    hit_d = (diag - jnp.reshape(col_lse, (n, 1))) >= (row_max_b - tol)  # (N, 1)
    acc_t = jnp.sum(jnp.where(hit_t, 1.0, 0.0)) * inv_n
    acc_d = jnp.sum(jnp.where(hit_d, 1.0, 0.0)) * inv_n

    out_ref[0] = 0.5 * (ce_d + ce_t)      # total_loss
    out_ref[1] = acc_t
    out_ref[2] = acc_d
    out_ref[3] = 0.5 * (acc_t + acc_d)    # acc_t_d


@jax.jit
def clip_loss(drug_features, text_features, logit_scale_d):
    """Wrapper: returns dict with total_loss / acc_t / acc_d / acc_t_d (f32 scalars)."""
    n, dim = drug_features.shape
    assert text_features.shape == (n, dim)
    scale = jnp.asarray(logit_scale_d, jnp.float32).reshape(1)
    itemsize = jnp.dtype(drug_features.dtype).itemsize

    # Gridless path keeps the (N, N) f32 logits (+ one exp temp and fused
    # reduction temporaries) resident in VMEM.  Budget ~4 * N^2 * 4 B of
    # scoped VMEM.  Cutover (per generation physical VMEM: 128 MiB on
    # v5e/v6e, 64 MiB per core on v7x) enforced below.
    n_sq_bytes = n * n * 4
    io_bytes = 2 * 2 * n * dim * itemsize          # double-buffered input tiles
    needed = 4 * n_sq_bytes + io_bytes + (2 << 20)
    if needed > 56 * 1024 * 1024:
        # TODO(synk): tiled two-pass (flash-style row/col LSE accumulation,
        # then max-comparison pass) with a "parallel" row-tile axis for large
        # N and v7x megacore; not needed at demo shapes.
        raise NotImplementedError(
            f"gridless ClipLoss kernel exceeds the VMEM budget at N={n}; "
            "a tiled two-pass kernel is required")
    vmem_limit = int(min(max(needed, 16 << 20), 96 << 20))

    # Advisory cost hint for XLA's scheduler around the custom call.
    cost = pl.CostEstimate(
        flops=2 * n * n * dim + 12 * n * n,        # matmul + elementwise sweeps
        transcendentals=n * n + 2 * n,             # one exp sweep + log vectors
        bytes_accessed=2 * n * dim * itemsize + 4 + 4 * 4,
    )

    # TODO(synk): at production shapes align N and D to multiples of 128
    # (pad + mask) for full lane/MXU utilization; demo shapes are left as-is.
    out = pl.pallas_call(
        _clip_loss_kernel,
        out_shape=jax.ShapeDtypeStruct((4,), jnp.float32),
        in_specs=[
            pl.BlockSpec(memory_space=pltpu.MemorySpace.SMEM),   # logit_scale (1,)
            pl.BlockSpec(memory_space=pltpu.MemorySpace.VMEM),   # drug_features (N, D)
            pl.BlockSpec(memory_space=pltpu.MemorySpace.VMEM),   # text_features (N, D)
        ],
        out_specs=pl.BlockSpec(memory_space=pltpu.MemorySpace.SMEM),
        compiler_params=pltpu.CompilerParams(vmem_limit_bytes=vmem_limit),
        cost_estimate=cost,
    )(scale, drug_features, text_features)

    return {
        "total_loss": out[0],
        "acc_t": out[1],
        "acc_d": out[2],
        "acc_t_d": out[3],
    }


def _reference(drug, text, scale):
    """Pure-JAX reference mirroring the PyTorch forward (full-precision matmuls)."""
    hp = lax.Precision.HIGHEST
    logits_d = scale * jnp.matmul(drug, text.T, precision=hp)
    logits_t = scale * jnp.matmul(text, drug.T, precision=hp)
    n = logits_d.shape[0]

    def ce(logits):
        return jnp.mean(jax.nn.logsumexp(logits, axis=1)
                        - logits[jnp.arange(n), jnp.arange(n)])

    def acc(logits):
        sm = jax.nn.softmax(logits, axis=0)
        return jnp.sum(jnp.argmax(sm, axis=1) == jnp.arange(n)) / n

    total_loss = 0.5 * (ce(logits_d) + ce(logits_t))
    acc_d = acc(logits_d)
    acc_t = acc(logits_t)
    return {"total_loss": total_loss, "acc_t": acc_t, "acc_d": acc_d,
            "acc_t_d": 0.5 * (acc_t + acc_d)}


if __name__ == "__main__":
    # Deterministic parameter init (module __init__): logit_scale_d = log(1/0.07)
    logit_scale_d = float(math.log(1.0 / 0.07))

    # Small shapes: batch N=8, embedding D=32
    N, D = 8, 32
    key = jax.random.PRNGKey(0)
    k_drug, k_text = jax.random.split(key)
    drug_features = jax.random.normal(k_drug, (N, D), dtype=jnp.float32)
    text_features = jax.random.normal(k_text, (N, D), dtype=jnp.float32)
    # L2-normalize (as CLIP feature extractors do upstream)
    drug_features = drug_features / jnp.linalg.norm(drug_features, axis=1, keepdims=True)
    text_features = text_features / jnp.linalg.norm(text_features, axis=1, keepdims=True)

    result = clip_loss(drug_features, text_features, logit_scale_d)
    jax.block_until_ready(result)

    ref = _reference(drug_features, text_features, logit_scale_d)
    for k in ("total_loss", "acc_t", "acc_d", "acc_t_d"):
        assert jnp.allclose(result[k], ref[k], atol=1e-4, rtol=1e-4), (
            k, result[k], ref[k])

    print("KERNEL_OK")
</pallas_src>

<mosaic_0001>
module attributes {stable_mosaic.version = 11 : i64} {
  func.func @_clip_loss_kernel(%arg0: memref<1xf32, #tpu.memory_space<smem>>, %arg1: memref<8x32xf32, #tpu.memory_space<vmem>>, %arg2: memref<8x32xf32, #tpu.memory_space<vmem>>, %arg3: memref<4xf32, #tpu.memory_space<smem>>) attributes {dimension_semantics = [], scalar_prefetch = 0 : i64, scratch_operands = 0 : i64, tpu.core_type = #tpu.core_type<tc>} {
    %c0 = arith.constant 0 : index
    %0 = memref.load %arg0[%c0] : memref<1xf32, #tpu.memory_space<smem>>
    %c0_0 = arith.constant 0 : index
    %c0_1 = arith.constant 0 : index
    %1 = vector.load %arg1[%c0_0, %c0_1] : memref<8x32xf32, #tpu.memory_space<vmem>>, vector<8x32xf32>
    %c0_2 = arith.constant 0 : index
    %c0_3 = arith.constant 0 : index
    %2 = vector.load %arg2[%c0_2, %c0_3] : memref<8x32xf32, #tpu.memory_space<vmem>>, vector<8x32xf32>
    %cst = arith.constant dense<0.000000e+00> : vector<8x8xf32>
    %3 = tpu.matmul %1, %2, %cst {dimension_numbers = #tpu.dot_dimension_numbers<[1], [1], [0], [0], [0, 0, 1, 0], [], []>, precision = #tpu.contract_precision<fp32>} : vector<8x32xf32>, vector<8x32xf32>, vector<8x8xf32> -> vector<8x8xf32>
    %4 = vector.broadcast %0 : f32 to vector<8x8xf32>
    %5 = arith.mulf %4, %3 : vector<8x8xf32>
    %6 = arith.mulf %1, %2 : vector<8x32xf32>
    %cst_4 = arith.constant dense<0.000000e+00> : vector<8xf32>
    %7 = vector.multi_reduction <add>, %6, %cst_4 [1] : vector<8x32xf32> to vector<8xf32>
    %8 = vector.shape_cast %7 : vector<8xf32> to vector<8x1xf32>
    %9 = vector.broadcast %0 : f32 to vector<8x1xf32>
    %10 = arith.mulf %9, %8 : vector<8x1xf32>
    %11 = vector.shape_cast %5 : vector<8x8xf32> to vector<1x8x8xf32>
    %cst_5 = arith.constant dense<0xFF800000> : vector<1xf32>
    %12 = vector.multi_reduction <maximumf>, %11, %cst_5 [1, 2] : vector<1x8x8xf32> to vector<1xf32>
    %13 = vector.shape_cast %12 : vector<1xf32> to vector<1x1x1xf32>
    %14 = vector.extract %13[0, 0, 0] : f32 from vector<1x1x1xf32>
    %15 = vector.broadcast %14 : f32 to vector<8x8xf32>
    %16 = arith.subf %5, %15 : vector<8x8xf32>
    %17 = math.exp %16 : vector<8x8xf32>
    %cst_6 = arith.constant dense<0.000000e+00> : vector<8xf32>
    %18 = vector.multi_reduction <add>, %17, %cst_6 [1] : vector<8x8xf32> to vector<8xf32>
    %19 = vector.shape_cast %18 : vector<8xf32> to vector<8x1xf32>
    %20 = math.log %19 : vector<8x1xf32>
    %21 = vector.broadcast %14 : f32 to vector<8x1xf32>
    %22 = arith.addf %21, %20 : vector<8x1xf32>
    %cst_7 = arith.constant dense<0.000000e+00> : vector<8xf32>
    %23 = vector.multi_reduction <add>, %17, %cst_7 [0] : vector<8x8xf32> to vector<8xf32>
    %24 = vector.shape_cast %23 : vector<8xf32> to vector<1x8xf32>
    %25 = math.log %24 : vector<1x8xf32>
    %26 = vector.broadcast %14 : f32 to vector<1x8xf32>
    %27 = arith.addf %26, %25 : vector<1x8xf32>
    %28 = vector.shape_cast %10 : vector<8x1xf32> to vector<1x8x1xf32>
    %cst_8 = arith.constant dense<0.000000e+00> : vector<1xf32>
    %29 = vector.multi_reduction <add>, %28, %cst_8 [1, 2] : vector<1x8x1xf32> to vector<1xf32>
    %30 = vector.shape_cast %29 : vector<1xf32> to vector<1x1x1xf32>
    %31 = vector.extract %30[0, 0, 0] : f32 from vector<1x1x1xf32>
    %32 = vector.shape_cast %22 : vector<8x1xf32> to vector<1x8x1xf32>
    %cst_9 = arith.constant dense<0.000000e+00> : vector<1xf32>
    %33 = vector.multi_reduction <add>, %32, %cst_9 [1, 2] : vector<1x8x1xf32> to vector<1xf32>
    %34 = vector.shape_cast %33 : vector<1xf32> to vector<1x1x1xf32>
    %35 = vector.extract %34[0, 0, 0] : f32 from vector<1x1x1xf32>
    %36 = arith.subf %35, %31 : f32
    %cst_10 = arith.constant 1.250000e-01 : f32
    %37 = arith.mulf %36, %cst_10 : f32
    %38 = vector.shape_cast %27 : vector<1x8xf32> to vector<1x1x8xf32>
    %cst_11 = arith.constant dense<0.000000e+00> : vector<1xf32>
    %39 = vector.multi_reduction <add>, %38, %cst_11 [1, 2] : vector<1x1x8xf32> to vector<1xf32>
    %40 = vector.shape_cast %39 : vector<1xf32> to vector<1x1x1xf32>
    %41 = vector.extract %40[0, 0, 0] : f32 from vector<1x1x1xf32>
    %42 = arith.subf %41, %31 : f32
    %cst_12 = arith.constant 1.250000e-01 : f32
    %43 = arith.mulf %42, %cst_12 : f32
    %44 = vector.broadcast %22 : vector<8x1xf32> to vector<8x8xf32>
    %45 = arith.subf %5, %44 : vector<8x8xf32>
    %cst_13 = arith.constant dense<0xFF800000> : vector<8xf32>
    %46 = vector.multi_reduction <maximumf>, %45, %cst_13 [0] : vector<8x8xf32> to vector<8xf32>
    %47 = vector.shape_cast %46 : vector<8xf32> to vector<1x8xf32>
    %48 = vector.broadcast %27 : vector<1x8xf32> to vector<8x8xf32>
    %49 = arith.subf %5, %48 : vector<8x8xf32>
    %cst_14 = arith.constant dense<0xFF800000> : vector<8xf32>
    %50 = vector.multi_reduction <maximumf>, %49, %cst_14 [1] : vector<8x8xf32> to vector<8xf32>
    %51 = vector.shape_cast %50 : vector<8xf32> to vector<8x1xf32>
    %52 = math.absf %14 : f32
    %cst_15 = arith.constant 1.000000e+00 : f32
    %53 = arith.addf %cst_15, %52 : f32
    %cst_16 = arith.constant 9.99999974E-6 : f32
    %54 = arith.mulf %cst_16, %53 : f32
    %55 = arith.subf %10, %22 : vector<8x1xf32>
    %56 = vector.shape_cast %55 : vector<8x1xf32> to vector<1x8xf32>
    %57 = vector.broadcast %54 : f32 to vector<1x8xf32>
    %58 = arith.subf %47, %57 : vector<1x8xf32>
    %59 = arith.cmpf oge, %56, %58 : vector<1x8xf32>
    %60 = vector.shape_cast %27 : vector<1x8xf32> to vector<8x1xf32>
    %61 = arith.subf %10, %60 : vector<8x1xf32>
    %62 = vector.broadcast %54 : f32 to vector<8x1xf32>
    %63 = arith.subf %51, %62 : vector<8x1xf32>
    %64 = arith.cmpf oge, %61, %63 : vector<8x1xf32>
    %cst_17 = arith.constant 1.000000e+00 : f32
    %cst_18 = arith.constant 0.000000e+00 : f32
    %65 = vector.broadcast %cst_17 : f32 to vector<1x8xf32>
    %66 = vector.broadcast %cst_18 : f32 to vector<1x8xf32>
    %67 = arith.select %59, %65, %66 : vector<1x8xi1>, vector<1x8xf32>
    %68 = vector.shape_cast %67 : vector<1x8xf32> to vector<1x1x8xf32>
    %cst_19 = arith.constant dense<0.000000e+00> : vector<1xf32>
    %69 = vector.multi_reduction <add>, %68, %cst_19 [1, 2] : vector<1x1x8xf32> to vector<1xf32>
    %70 = vector.shape_cast %69 : vector<1xf32> to vector<1x1x1xf32>
    %71 = vector.extract %70[0, 0, 0] : f32 from vector<1x1x1xf32>
    %cst_20 = arith.constant 1.250000e-01 : f32
    %72 = arith.mulf %71, %cst_20 : f32
    %cst_21 = arith.constant 1.000000e+00 : f32
    %cst_22 = arith.constant 0.000000e+00 : f32
    %73 = vector.broadcast %cst_21 : f32 to vector<8x1xf32>
    %74 = vector.broadcast %cst_22 : f32 to vector<8x1xf32>
    %75 = arith.select %64, %73, %74 : vector<8x1xi1>, vector<8x1xf32>
    %76 = vector.shape_cast %75 : vector<8x1xf32> to vector<1x8x1xf32>
    %cst_23 = arith.constant dense<0.000000e+00> : vector<1xf32>
    %77 = vector.multi_reduction <add>, %76, %cst_23 [1, 2] : vector<1x8x1xf32> to vector<1xf32>
    %78 = vector.shape_cast %77 : vector<1xf32> to vector<1x1x1xf32>
    %79 = vector.extract %78[0, 0, 0] : f32 from vector<1x1x1xf32>
    %cst_24 = arith.constant 1.250000e-01 : f32
    %80 = arith.mulf %79, %cst_24 : f32
    %81 = arith.addf %37, %43 : f32
    %cst_25 = arith.constant 5.000000e-01 : f32
    %82 = arith.mulf %cst_25, %81 : f32
    %c0_26 = arith.constant 0 : index
    %83 = memref.load %arg3[%c0_26] : memref<4xf32, #tpu.memory_space<smem>>
    memref.store %82, %arg3[%c0_26] : memref<4xf32, #tpu.memory_space<smem>>
    %c1 = arith.constant 1 : index
    %84 = memref.load %arg3[%c1] : memref<4xf32, #tpu.memory_space<smem>>
    memref.store %72, %arg3[%c1] : memref<4xf32, #tpu.memory_space<smem>>
    %c2 = arith.constant 2 : index
    %85 = memref.load %arg3[%c2] : memref<4xf32, #tpu.memory_space<smem>>
    memref.store %80, %arg3[%c2] : memref<4xf32, #tpu.memory_space<smem>>
    %86 = arith.addf %72, %80 : f32
    %cst_27 = arith.constant 5.000000e-01 : f32
    %87 = arith.mulf %cst_27, %86 : f32
    %c3 = arith.constant 3 : index
    %88 = memref.load %arg3[%c3] : memref<4xf32, #tpu.memory_space<smem>>
    memref.store %87, %arg3[%c3] : memref<4xf32, #tpu.memory_space<smem>>
    return
  }
}

</mosaic_0001>

<bundles_post_ra>
// kernel: clip_loss.1
= control target key start
LH: loop header
LB: loop body
LE: loop exit
PB: predicated region body
PF: predicated region fallthrough
CT: control target
= control target key end

     0   :  { %9 = vsyncpa [#allocation4], 0  ;;  %s512_s0 = inlined_call_operand.<no memory space> [shape: f32[1], index: 0, kind: input, shape index: {}]   ;;  %s513_s1 = inlined_call_operand.hbm [shape: f32[8,32], index: 1, kind: input, shape index: {}]   ;;  %s514_s2 = inlined_call_operand.hbm [shape: f32[8,32], index: 2, kind: input, shape index: {}]   ;;  %s515_s3 = inlined_call_operand.vmem [shape: f32[4], index: 3, kind: output, shape index: {}]  }
   0x1   :  { %10 = vsyncpa [#allocation7], 0 }
   0x2   :  { %11 = vsyncpa [#allocation5], 0  ;;  %s19_s14 = sshll.u32 %s513_s1, 4  ;;  %s462_s15 = smov [#allocation3]   ;;  %s20_s14 = int_to_ptr.hbm [resolvable:$true] %s19_s14 }
   0x3   :  { %s21_s16 = sshll.u32 %s462_s15, 4  ;;  %s30_s19 = sshll.u32 %s514_s2, 4  ;;  %s22_s16 = int_to_ptr.vmem [resolvable:$true] %s21_s16  ;;  %s31_s19 = int_to_ptr.hbm [resolvable:$true] %s30_s19 }
   0x4   :  { %24 = dma.hbm_to_vmem [thread:$0]  %s20_s14, 128, %s22_s16, [#allocation4]  }
   0x5   :  { %s463_s20 = smov [#allocation6]  }
   0x6   :  { %s32_s21 = sshll.u32 %s463_s20, 4  ;;  %s33_s21 = int_to_ptr.vmem [resolvable:$true] %s32_s21 }
   0x7   :  { %35 = dma.hbm_to_vmem [thread:$0]  %s31_s19, 128, %s33_s21, [#allocation7]  }
   0x8   :  { %456 = dma.done.wait [#allocation4], 128  }
   0x9   :  { %457 = vsyncadd [#allocation4], 4294967168 }
   0xa   :  { %458 = dma.done.wait [#allocation7], 128  }
   0xb   :  { %459 = vsyncadd [#allocation7], 4294967168  ;;  %vm47_vm0 = vcmask 261120   ;;  %v46_v0 = vld [vmem:[#allocation6] sm:$0xff]  ;;  %v45_v1 = vld [vmem:[#allocation3] sm:$0xff]  ;;  %v200_v24 = vstv %s512_s0  ;;  %vm207_vm1 = vcmask 64512   ;;  %v292_v40 = vlaneseq }
   0xc   :  { %v52_v2 = vsel %vm47_vm0, %v46_v0, 0  ;;  %v49_v3 = vsel %vm47_vm0, %v45_v1, 0  ;;  %v202_v35 = vmul.f32 %v46_v0, %v45_v1  ;;  %vm237_vm2 = vcmask 7168   ;;  %s358_s13 = sshll.u32 %s515_s3, 4  ;;  %s466_s16 = smov [#allocation8]   ;;  %s359_s13 = int_to_ptr.vmem [resolvable:$true] %s358_s13 }
   0xd   :  { %v69_v4 = vand.u32 4294901760, %v52_v2  ;;  %v71_v5 = vand.u32 4294901760, %v49_v3  ;;  %v293_v41 = vshrl.u32 %v292_v40, 7  ;;  %vm260_vm5 = vcmask 57344  }
   0xe   :  { %v203_v36 = vsel %vm47_vm0, %v202_v35, 0.0  ;;  %v315_v35 = vand.u32 127, %v292_v40 }
   0xf   :  { %v96_v6 = vsub.f32 %v52_v2, %v69_v4  ;;  %70 = vmatpush.xpose.msra.mxu0 %v69_v4  ;;  %146 = vmatpush.xpose.msra.mxu3 %v69_v4  ;;  %v72_v7 = vsub.f32 %v49_v3, %v71_v5 }
  0x10   :  { %204 = vadd.xlane.f32.xlu1 %v203_v36  ;;  %388 = vset.pattern.permute.xlu2 %v293_v41 }
  0x11   :  { %123 = vmatpush.xpose.msra.mxu2 %v96_v6  ;;  %v97_v8 = vand.u32 4294901760, %v96_v6  ;;  %v73_v9 = vand.u32 4294901760, %v72_v7  ;;  %387 = vset.pattern.permute.xlu1 %v293_v41 }
  0x13   :  { %v98_v10 = vsub.f32 %v96_v6, %v97_v8  ;;  %v74_v11 = vsub.f32 %v72_v7, %v73_v9  ;;  %150 = vmatmul.f32.vlgmr.msra.gmra.mxu3 %v73_v9  ;;  %172 = vmatpush.xpose.msrb.mxu0 %v97_v8 }
  0x14   :  { %126 = vmatmul.f32.vlgmr.msra.gmra.mxu2 %v72_v7 }
  0x15   :  { %v99_v12 = vand.u32 4294901760, %v98_v10  ;;  %v75_v13 = vand.u32 4294901760, %v74_v11 }
  0x17   :  { %100 = vmatpush.xpose.msra.mxu1 %v99_v12  ;;  %76 = vmatmul.f32.vlgmr.msra.gmra.mxu0 %v75_v13 }
  0x1a   :  { %102 = vmatmul.f32.vlgmr.msra.gmra.mxu1 %v71_v5 }
  0x1b   :  { %194 = vmatpush.xpose.msrb.mxu1 %v69_v4 }
  0x1f   :  { %174 = vmatmul.f32.vlgmr.msrb.gmra.mxu0 %v71_v5 }
  0x22   :  { %196 = vmatmul.f32.vlgmr.msrb.gmra.mxu1 %v71_v5 }
  0x83   :  { %v205_v56 = vpop.xlane.xlu1 %204 }
  0x84   :  { %v206_v59 = vmul.f32 %v205_v56, %v200_v24 }
  0x86   :  { %v238_v8 = vsel %vm237_vm2, %v206_v59, 0.0 }
  0x94   :  { %v77_v14 = vpop.f32.mrf.mxu0 }
  0x96   :  { %v151_v18 = vpop.f32.mrf.mxu3 }
  0x97   :  { %v103_v15 = vpop.f32.mrf.mxu1  ;;  %v127_v16 = vpop.f32.mrf.mxu2 }
  0x98   :  { %v104_v17 = vadd.f32 %v103_v15, %v77_v14  ;;  %v464_v14 = vmov 0.0  }
  0x9a   :  { %v128_v19 = vadd.f32 %v127_v16, %v104_v17  ;;  %v465_v17 = vmov 0  }
  0x9b   :  { %389 = vset.pattern.permute.xlu0 %v465_v17 }
  0x9c   :  { %v152_v20 = vadd.f32 %v151_v18, %v128_v19  ;;  %v175_v21 = vpop.f32.mrf.mxu0 }
  0x9e   :  { %v176_v22 = vadd.f32 %v175_v21, %v152_v20 }
  0x9f   :  { %v197_v23 = vpop.f32.mrf.mxu1 }
  0xa0   :  { %v198_v25 = vadd.f32 %v197_v23, %v176_v22 }
  0xa2   :  { %v201_v26 = vmul.f32 %v200_v24, %v198_v25 }
  0xa4   :  { %v208_v27 = vsel %vm207_vm1, %v201_v26, -inf }
  0xa5   :  { %209 = vmax.xlane.f32.xlu0 %v208_v27 }
 0x118   :  { %v210_v28 = vpop.xlane.xlu0 %209 }
 0x119   :  { %v211_v29 = vrot.slane %v210_v28, 4 }
 0x11b   :  { %v212_v30 = vmax.f32 %v210_v28, %v211_v29 }
 0x11d   :  { %v213_v31 = vrot.slane %v212_v30, 2 }
 0x11f   :  { %v214_v32 = vmax.f32 %v212_v30, %v213_v31 }
 0x121   :  { %v215_v33 = vrot.slane %v214_v32, 1 }
 0x123   :  { %v216_v34 = vmax.f32 %v214_v32, %v215_v33 }
 0x125   :  { %370 = vpush %v216_v34 }
 0x156   :  { %s500_s22 = spop %370 }
 0x157   :  { %v218_v37 = vstv %s500_s22  ;;  %s285_s0 = sand.u32 2147483647, %s500_s22 }
 0x158   :  { %v219_v38 = vsub.f32 %v201_v26, %v218_v37  ;;  %s286_s23 = sadd.f32 1.0, %s285_s0 }
 0x15a   :  { %v220_v39 = vmul.f32 1.442695, %v219_v38  ;;  %s287_s24 = smul.f32 1e-05, %s286_s23 }
 0x15c   :  { %390 = vpow2.f32 %v220_v39  ;;  %v289_v6 = vstv %s287_s24 }
 0x162   :  { %v391_v42 = vpop.eup %390 }
 0x163   :  { %v222_v43 = vsel %vm207_vm1, %v391_v42, 0.0 }
 0x164   :  { %223 = vadd.xlane.f32.xlu0 %v222_v43  ;;  %v228_v44 = vrot.slane %v222_v43, 4 }
 0x166   :  { %v229_v45 = vadd.f32 %v228_v44, %v222_v43 }
 0x168   :  { %v230_v46 = vrot.slane %v229_v45, 2 }
 0x16a   :  { %v231_v47 = vadd.f32 %v230_v46, %v229_v45 }
 0x16c   :  { %v232_v48 = vrot.slane %v231_v47, 1 }
 0x16e   :  { %v233_v49 = vadd.f32 %v232_v48, %v231_v47 }
 0x170   :  { %392 = vlog2.f32 %v233_v49 }
 0x176   :  { %v393_v50 = vpop.eup %392 }
 0x177   :  { %v235_v51 = vmul.f32 0.6931472, %v393_v50 }
 0x179   :  { %v236_v52 = vadd.f32 %v235_v51, %v218_v37 }
 0x17b   :  { %v281_v53 = vsub.f32 %v201_v26, %v236_v52  ;;  %v261_v29 = vsel %vm260_vm5, %v236_v52, 0.0 }
 0x17d   :  { %v282_v54 = vsel %vm207_vm1, %v281_v53, -inf }
 0x17e   :  { %283 = vmax.xlane.f32.xlu2 %v282_v54 }
 0x196   :  { %304 = vperm.xlu2 %388, %v236_v52  }
 0x1bf   :  { %239 = vadd.xlane.f32.xlu2 %v238_v8 }
 0x1d7   :  { %v224_v55 = vpop.xlane.xlu0 %223 }
 0x1d8   :  { %394 = vlog2.f32 %v224_v55 }
 0x1de   :  { %v395_v57 = vpop.eup %394 }
 0x1df   :  { %v226_v58 = vmul.f32 0.6931472, %v395_v57 }
 0x1e1   :  { %v227_v60 = vadd.f32 %v226_v58, %v218_v37 }
 0x1e3   :  { %v273_v61 = vsub.f32 %v201_v26, %v227_v60  ;;  %v288_v62 = vsub.f32 %v206_v59, %v227_v60  ;;  %v248_v13 = vsel %vm237_vm2, %v227_v60, 0.0 }
 0x1e5   :  { %v274_v63 = vsel %vm207_vm1, %v273_v61, -inf }
 0x1e6   :  { %v275_v0 = vrot.slane %v274_v63, 4 }
 0x1e8   :  { %v276_v1 = vmax.f32 %v274_v63, %v275_v0 }
 0x1ea   :  { %v277_v2 = vrot.slane %v276_v1, 2 }
 0x1ec   :  { %v278_v3 = vmax.f32 %v276_v1, %v277_v2 }
 0x1ee   :  { %v279_v4 = vrot.slane %v278_v3, 1 }
 0x1f0   :  { %v280_v5 = vmax.f32 %v278_v3, %v279_v4 }
 0x1f1   :  { %v284_v9 = vpop.xlane.xlu2 %283 }
 0x1f2   :  { %v290_v7 = vsub.f32 %v280_v5, %v289_v6  ;;  %v307_v12 = vsub.f32 %v284_v9, %v289_v6 }
 0x1f4   :  { %296 = vperm.xlu1 %387, %v290_v7  }
 0x1f9   :  { %v305_v10 = vpop.permute.xlu2 %304 }
 0x1fa   :  { %v306_v11 = vsub.f32 %v206_v59, %v305_v10 }
 0x1fc   :  { %vm308_vm3 = vcmp.ge.f32.partialorder %v306_v11, %v307_v12 }
 0x1fd   :  { %v329_v15 = vsel %vm308_vm3, 1.0, %v464_v14 }
 0x1fe   :  { %v330_v16 = vsel %vm237_vm2, %v329_v15, 0.0 }
 0x21e   :  { %249 = vadd.xlane.f32.xlu1 %v248_v13 }
 0x226   :  { %331 = vadd.xlane.f32.xlu1 %v330_v16 }
 0x232   :  { %v240_v20 = vpop.xlane.xlu2 %239 }
 0x233   :  { %v241_v21 = vrot.slane %v240_v20, 4 }
 0x235   :  { %v242_v22 = vadd.f32 %v241_v21, %v240_v20 }
 0x237   :  { %v243_v23 = vrot.slane %v242_v22, 2 }
 0x239   :  { %v244_v24 = vadd.f32 %v243_v23, %v242_v22 }
 0x23b   :  { %v245_v25 = vrot.slane %v244_v24, 1 }
 0x23d   :  { %v246_v26 = vadd.f32 %v245_v25, %v244_v24 }
 0x23f   :  { %372 = vpush %v246_v26 }
 0x266   :  { %v297_v18 = vpop.permute.xlu1 %296 }
 0x267   :  { %vm299_vm4 = vcmp.ge.f32.partialorder %v288_v62, %v297_v18 }
 0x268   :  { %v309_v19 = vsel %vm299_vm4, 1.0, %v464_v14 }
 0x269   :  { %312 = vperm.xlu0 %389, %v309_v19  }
 0x270   :  { %s373_s25 = spop %372 }
 0x291   :  { %v250_v27 = vpop.xlane.xlu1 %249 }
 0x292   :  { %v251_v28 = vrot.slane %v250_v27, 4 }
 0x293   :  { %262 = vadd.xlane.f32.xlu0 %v261_v29 }
 0x294   :  { %v252_v30 = vadd.f32 %v251_v28, %v250_v27 }
 0x296   :  { %v253_v31 = vrot.slane %v252_v30, 2 }
 0x298   :  { %v254_v32 = vadd.f32 %v253_v31, %v252_v30 }
 0x299   :  { %v332_v47 = vpop.xlane.xlu1 %331 }
 0x29a   :  { %v255_v33 = vrot.slane %v254_v32, 1  ;;  %v333_v40 = vrot.slane %v332_v47, 4 }
 0x29c   :  { %v256_v34 = vadd.f32 %v255_v33, %v254_v32  ;;  %v334_v48 = vadd.f32 %v333_v40, %v332_v47 }
 0x29e   :  { %374 = vpush %v256_v34  ;;  %v335_v49 = vrot.slane %v334_v48, 2 }
 0x2a0   :  { %v336_v53 = vadd.f32 %v335_v49, %v334_v48 }
 0x2a2   :  { %v337_v56 = vrot.slane %v336_v53, 1 }
 0x2a4   :  { %v338_v59 = vadd.f32 %v337_v56, %v336_v53 }
 0x2cf   :  { %s375_s26 = spop %374 }
 0x2d0   :  { %s258_s27 = ssub.f32 %s375_s26, %s373_s25 }
 0x2d2   :  { %s259_s30 = smul.f32 0.125, %s258_s27 }
 0x2db   :  { %v313_v36 = vpop.permute.xlu0 %312 }
 0x2dc   :  { %v316_v37 = vperm.slane %v313_v36, %v315_v35 }
 0x2de   :  { %v318_v38 = vsel %vm260_vm5, %v316_v37, 0.0 }
 0x2df   :  { %319 = vadd.xlane.f32.xlu2 %v318_v38 }
 0x306   :  { %v263_v39 = vpop.xlane.xlu0 %262 }
 0x307   :  { %v264_v41 = vrot.slane %v263_v39, 4 }
 0x309   :  { %v265_v42 = vadd.f32 %v264_v41, %v263_v39 }
 0x30b   :  { %v266_v43 = vrot.slane %v265_v42, 2 }
 0x30d   :  { %v267_v44 = vadd.f32 %v266_v43, %v265_v42 }
 0x30f   :  { %v268_v45 = vrot.slane %v267_v44, 1 }
 0x311   :  { %v269_v46 = vadd.f32 %v268_v45, %v267_v44 }
 0x313   :  { %376 = vpush %v269_v46 }
 0x344   :  { %s377_s28 = spop %376 }
 0x345   :  { %s271_s29 = ssub.f32 %s377_s28, %s373_s25 }
 0x347   :  { %s272_s4 = smul.f32 0.125, %s271_s29 }
 0x349   :  { %s341_s5 = sadd.f32 %s272_s4, %s259_s30 }
 0x34b   :  { %s342_s6 = smul.f32 0.5, %s341_s5 }
 0x34d   :  { %344 = sst [smem:[#allocation8]] %s342_s6 }
 0x352   :  { %v320_v50 = vpop.xlane.xlu2 %319 }
 0x353   :  { %v321_v51 = vrot.slane %v320_v50, 4 }
 0x355   :  { %v322_v52 = vadd.f32 %v321_v51, %v320_v50 }
 0x357   :  { %v323_v54 = vrot.slane %v322_v52, 2 }
 0x359   :  { %v324_v55 = vadd.f32 %v323_v54, %v322_v52 }
 0x35b   :  { %v325_v57 = vrot.slane %v324_v55, 1 }
 0x35d   :  { %v326_v58 = vadd.f32 %v325_v57, %v324_v55 }
 0x35f   :  { %378 = vpush %v326_v58 }
 0x360   :  { %380 = vpush %v338_v59 }
 0x390   :  { %s379_s7 = spop %378 }
 0x391   :  { %s328_s8 = smul.f32 0.125, %s379_s7  ;;  %s381_s9 = spop %380 }
 0x392   :  { %s340_s10 = smul.f32 0.125, %s381_s9 }
 0x393   :  { %346 = sst [smem:[#allocation8 + $0x1]] %s328_s8 }
 0x394   :  { %348 = sst [smem:[#allocation8 + $0x2]] %s340_s10 }
 0x395   :  { %s349_s14 = sadd.f32 %s340_s10, %s328_s8 }
 0x397   :  { %s350_s15 = smul.f32 0.5, %s349_s14 }
 0x399   :  { %352 = sst [smem:[#allocation8 + $0x3]] %s350_s15 }
 0x39a   :  { %361 = dma.smem_to_vmem %s466_s16, 16, %s359_s13, [#allocation5]  }
 0x39b   :  { %460 = dma.done.wait [#allocation5], 16  }
 0x39c   :  { %461 = vsyncadd [#allocation5], 4294967280 }
 0x39d   :  { %366 = sfence }
 0x39e   :  { %367 = vsyncpa [#allocation4], 1 }
 0x39f   :  { %368 = vsyncpa [#allocation7], 1 }
 0x3a0   :  { %369 = vsyncpa [#allocation5], 1 }

</bundles_post_ra>
